<compile_context>
chip_gen: v7x
topology: tpu7x:2x2x1
jax: 0.10.0
libtpu: 0.0.40
codegen_flags: <defaults>
</compile_context>

<pallas_src>
import jax
import jax.numpy as jnp
import numpy as np
from jax import lax
from jax.experimental import pallas as pl
from jax.experimental.pallas import tpu as pltpu

_VMEM_LIMIT_BYTES = 64 * 1024 * 1024    # explicit scoped-VMEM cap (<= v7x physical)
_VMEM_BUDGET_BYTES = 40 * 1024 * 1024   # target working set incl. double buffering


def _largest_divisor_tile(n, preferred, align):
    """Largest divisor of n that is <= preferred and a multiple of `align`.
    Falls back to n itself (full extent, always a legal block dim)."""
    if n <= preferred:
        return n
    t = (min(preferred, n) // align) * align
    while t >= align:
        if n % t == 0:
            return t
        t -= align
    return n


def _sublane(dtype):
    """Row-tile alignment: bf16 packs 16 rows per vreg, f32 packs 8."""
    return 16 if jnp.dtype(dtype).itemsize == 2 else 8


def _assert_fits(name, est_bytes):
    if est_bytes > _VMEM_LIMIT_BYTES:
        raise ValueError(
            f"{name}: estimated VMEM working set {est_bytes} B exceeds "
            f"{_VMEM_LIMIT_BYTES} B; pad / shrink the model dims or tiles.")


# ----------------------------------------------------------------------------
# Kernel 1: hoisted input projection  pregates = X @ W_ih^T + (b_ih + b_hh).
# One big row-tiled matmul over all B*T timesteps; output in the activation
# dtype (bf16 at real sizes) so the recurrence's HBM stream is halved.
# ----------------------------------------------------------------------------
def _pregates_kernel(x_ref, w_ref, b_ref, out_ref):
    x = x_ref[...]
    w = w_ref[...]
    out_ref[...] = (
        jnp.dot(x.astype(w.dtype), w, preferred_element_type=jnp.float32)
        + b_ref[...].astype(jnp.float32)
    ).astype(out_ref.dtype)


def input_projection(x2d, w_ih_t, b, out_dtype):
    """x2d: (N, H).  Returns (N, 4H) pre-gates in `out_dtype`."""
    N, H = x2d.shape
    G = w_ih_t.shape[1]
    act_b = jnp.dtype(x2d.dtype).itemsize
    out_b = jnp.dtype(out_dtype).itemsize
    w_b = jnp.dtype(w_ih_t.dtype).itemsize
    sub = _sublane(x2d.dtype)

    nt = _largest_divisor_tile(N, 512, sub)

    def est(nt_):
        return (2 * nt_ * H * act_b + 2 * nt_ * G * out_b
                + 2 * H * G * w_b + 2 * G * 4)

    while est(nt) > _VMEM_BUDGET_BYTES and nt % (2 * sub) == 0:
        nt //= 2
    _assert_fits("input_projection", est(nt))

    return pl.pallas_call(
        _pregates_kernel,
        out_shape=jax.ShapeDtypeStruct((N, G), out_dtype),
        grid_spec=pltpu.PrefetchScalarGridSpec(
            num_scalar_prefetch=0,
            grid=(N // nt,),
            in_specs=[
                pl.BlockSpec((nt, H), lambda n: (n, 0)),    # X rows
                pl.BlockSpec((H, G), lambda n: (0, 0)),     # W_ih^T (resident)
                pl.BlockSpec((1, G), lambda n: (0, 0)),     # bias
            ],
            out_specs=pl.BlockSpec((nt, G), lambda n: (n, 0)),
        ),
        compiler_params=pltpu.CompilerParams(
            dimension_semantics=("parallel",),
            vmem_limit_bytes=_VMEM_LIMIT_BYTES),
    )(x2d, w_ih_t, b)


# ----------------------------------------------------------------------------
# Kernel 2: LSTM recurrence over time, time blocked into chunks of Tc steps.
# Grid = (B/Bt, T/Tc), batch outer "parallel", time inner "arbitrary" (serial);
# h/c carried in VMEM scratch and zeroed at t_blk == 0 (states=None semantics).
# Gate column order is [i, f, o, g] (reordered at init time).
# ----------------------------------------------------------------------------
def _lstm_recurrence_kernel(pg_ref, whh_ref, y_ref, hT_ref, cT_ref, h_sc, c_sc):
    t_blk = pl.program_id(1)
    bt, Tc, G = pg_ref.shape
    H = h_sc.shape[-1]

    @pl.when(t_blk == 0)
    def _():
        h_sc[...] = jnp.zeros_like(h_sc)
        c_sc[...] = jnp.zeros_like(c_sc)

    whh = whh_ref[...]

    def step(i, carry):
        h, c = carry
        pg = pg_ref[:, pl.ds(i, 1), :].reshape(bt, G).astype(jnp.float32)
        gates = jnp.dot(h.astype(whh.dtype), whh,
                        preferred_element_type=jnp.float32) + pg      # (bt, 4H)
        # [i, f, o] share one contiguous sigmoid slab; g gets one tanh slab.
        # (128-lane aligned iff H % 128 == 0; pad H at real model sizes.)
        sg = jax.nn.sigmoid(gates[:, :3 * H])
        ig = sg[:, 0 * H:1 * H]
        fg = sg[:, 1 * H:2 * H]
        og = sg[:, 2 * H:3 * H]
        gg = jnp.tanh(gates[:, 3 * H:])
        c = fg * c + ig * gg
        h = og * jnp.tanh(c)
        y_ref[:, pl.ds(i, 1), :] = h.reshape(bt, 1, H).astype(y_ref.dtype)
        return h, c

    h, c = lax.fori_loop(0, Tc, step, (h_sc[...], c_sc[...]), unroll=2)
    h_sc[...] = h
    c_sc[...] = c

    @pl.when(t_blk == pl.num_programs(1) - 1)
    def _():
        hT_ref[...] = h.astype(hT_ref.dtype)
        cT_ref[...] = c.astype(cT_ref.dtype)


def lstm_layer(pregates, w_hh_t, out_dtype):
    """pregates: (B, T, 4H) batch-major.  Returns (y (B,T,H), h_T, c_T)."""
    B, T, G = pregates.shape
    H = G // 4
    act_b = jnp.dtype(pregates.dtype).itemsize
    out_b = jnp.dtype(out_dtype).itemsize
    w_b = jnp.dtype(w_hh_t.dtype).itemsize
    sub = _sublane(out_dtype)

    # Batch tile: >= 2 blocks where alignment allows (v7x megacore), <= 256
    # rows (fills the v6e/v7x 256-wide MXU M dim); falls back to full B.
    if B >= 2 * sub:
        bt = _largest_divisor_tile(B, min(256, B // 2), sub)
    else:
        bt = B
    # Time chunk: prefer 16 steps/grid step, shrink to fit the VMEM budget.
    tc = _largest_divisor_tile(T, 16, 8)

    def est(bt_, tc_):
        return (2 * bt_ * tc_ * G * act_b      # pre-gates blocks (double buffered)
                + 2 * bt_ * tc_ * H * out_b    # y blocks
                + 2 * H * G * w_b              # W_hh (2 pipeline buffers)
                + 2 * bt_ * H * 4              # h/c scratch
                + 4 * bt_ * H * 4)             # h_T / c_T blocks

    while est(bt, tc) > _VMEM_BUDGET_BYTES and tc % 16 == 0:
        tc //= 2
    while est(bt, tc) > _VMEM_BUDGET_BYTES and bt % (2 * sub) == 0:
        bt //= 2
    _assert_fits("lstm_layer", est(bt, tc))

    return pl.pallas_call(
        _lstm_recurrence_kernel,
        out_shape=(
            jax.ShapeDtypeStruct((B, T, H), out_dtype),
            jax.ShapeDtypeStruct((B, H), jnp.float32),
            jax.ShapeDtypeStruct((B, H), jnp.float32),
        ),
        grid_spec=pltpu.PrefetchScalarGridSpec(
            num_scalar_prefetch=0,
            grid=(B // bt, T // tc),
            in_specs=[
                pl.BlockSpec((bt, tc, G), lambda b, t: (b, t, 0)),  # pre-gates
                pl.BlockSpec((H, G), lambda b, t: (0, 0)),          # W_hh^T
            ],
            out_specs=(
                pl.BlockSpec((bt, tc, H), lambda b, t: (b, t, 0)),  # y slab
                pl.BlockSpec((bt, H), lambda b, t: (b, 0)),         # h_T
                pl.BlockSpec((bt, H), lambda b, t: (b, 0)),         # c_T
            ),
            scratch_shapes=[
                pltpu.VMEM((bt, H), jnp.float32),                   # h carry
                pltpu.VMEM((bt, H), jnp.float32),                   # c carry
            ],
        ),
        # Do NOT reorder: scratch-carried recurrence needs time serial & last.
        compiler_params=pltpu.CompilerParams(
            dimension_semantics=("parallel", "arbitrary"),
            vmem_limit_bytes=_VMEM_LIMIT_BYTES),
    )(pregates, w_hh_t)


# ----------------------------------------------------------------------------
# Kernels 3+4: output projection + log-softmax.
# Pass 1 tiles over (row blocks, vocab blocks): writes raw logits tiles AND a
# streaming max / log-sum-exp per row block (vocab axis = serial reduction).
# Pass 2 is a pure elementwise (logits - lse) subtract aliased in place — no
# second W_out stream, no duplicated matmul FLOPs.
# ----------------------------------------------------------------------------
def _logits_lse_kernel(x_ref, w_ref, b_ref, logits_ref, lse_ref, m_sc, l_sc):
    v = pl.program_id(1)

    @pl.when(v == 0)
    def _():
        m_sc[...] = jnp.full_like(m_sc, -jnp.inf)
        l_sc[...] = jnp.zeros_like(l_sc)

    x = x_ref[...]
    w = w_ref[...]
    logits = (jnp.dot(x.astype(w.dtype), w, preferred_element_type=jnp.float32)
              + b_ref[...].astype(jnp.float32))               # (Nt, Vt)
    logits_ref[...] = logits

    m_prev = m_sc[...]
    m_new = jnp.maximum(m_prev, jnp.max(logits, axis=-1, keepdims=True))
    l_sc[...] = (l_sc[...] * jnp.exp(m_prev - m_new)
                 + jnp.sum(jnp.exp(logits - m_new), axis=-1, keepdims=True))
    m_sc[...] = m_new

    @pl.when(v == pl.num_programs(1) - 1)
    def _():
        lse_ref[...] = m_sc[...] + jnp.log(l_sc[...])


def _sub_lse_kernel(logits_ref, lse_ref, out_ref):
    out_ref[...] = (logits_ref[...] - lse_ref[...]).astype(out_ref.dtype)


def output_logsoftmax(x2d, w_out_t, b_out):
    """x2d: (N, H) -> (N, V) f32 log-probs; never holds (H,V)/(N,V) in VMEM."""
    N, H = x2d.shape
    V = w_out_t.shape[1]
    act_b = jnp.dtype(x2d.dtype).itemsize
    w_b = jnp.dtype(w_out_t.dtype).itemsize
    sub = _sublane(x2d.dtype)

    nt = _largest_divisor_tile(N, 512, sub)      # larger nt => fewer W_out streams
    vt = _largest_divisor_tile(V, 2048, 128)

    def est(nt_, vt_):
        return (2 * nt_ * H * act_b              # x blocks
                + 2 * H * vt_ * w_b              # W_out column blocks
                + 2 * nt_ * vt_ * 4              # logits blocks (f32)
                + 2 * vt_ * 4 + 6 * nt_ * 4)     # bias + lse + scratch

    while est(nt, vt) > _VMEM_BUDGET_BYTES and vt % 256 == 0:
        vt //= 2
    while est(nt, vt) > _VMEM_BUDGET_BYTES and nt % (2 * sub) == 0:
        nt //= 2
    _assert_fits("output_logsoftmax", est(nt, vt))

    logits, lse = pl.pallas_call(
        _logits_lse_kernel,
        out_shape=(jax.ShapeDtypeStruct((N, V), jnp.float32),
                   jax.ShapeDtypeStruct((N, 1), jnp.float32)),
        grid_spec=pltpu.PrefetchScalarGridSpec(
            num_scalar_prefetch=0,
            grid=(N // nt, V // vt),
            in_specs=[
                pl.BlockSpec((nt, H), lambda n, v: (n, 0)),
                pl.BlockSpec((H, vt), lambda n, v: (0, v)),
                pl.BlockSpec((1, vt), lambda n, v: (0, v)),
            ],
            out_specs=(
                pl.BlockSpec((nt, vt), lambda n, v: (n, v)),
                pl.BlockSpec((nt, 1), lambda n, v: (n, 0)),
            ),
            scratch_shapes=[
                pltpu.VMEM((nt, 1), jnp.float32),   # running max
                pltpu.VMEM((nt, 1), jnp.float32),   # running sum(exp)
            ],
        ),
        compiler_params=pltpu.CompilerParams(
            dimension_semantics=("parallel", "arbitrary"),
            vmem_limit_bytes=_VMEM_LIMIT_BYTES),
    )(x2d, w_out_t, b_out)

    # Pass 2: elementwise subtract, in place on the logits buffer (P8 aliasing).
    logp = pl.pallas_call(
        _sub_lse_kernel,
        out_shape=jax.ShapeDtypeStruct((N, V), jnp.float32),
        grid_spec=pltpu.PrefetchScalarGridSpec(
            num_scalar_prefetch=0,
            grid=(N // nt, V // vt),
            in_specs=[
                pl.BlockSpec((nt, vt), lambda n, v: (n, v)),
                pl.BlockSpec((nt, 1), lambda n, v: (n, 0)),
            ],
            out_specs=pl.BlockSpec((nt, vt), lambda n, v: (n, v)),
        ),
        compiler_params=pltpu.CompilerParams(
            dimension_semantics=("parallel", "parallel"),
            vmem_limit_bytes=_VMEM_LIMIT_BYTES),
        input_output_aliases={0: 0},
    )(logits, lse)
    return logp


# ----------------------------------------------------------------------------
# Forward pass (glue in plain JAX: embedding gather and free reshapes only).
# Matches the "no_output_feeding" (teacher-forced / eval) path of the module.
# ----------------------------------------------------------------------------
def lstm_lm_forward(params, tokens, act_dtype=jnp.bfloat16):
    B, T = tokens.shape
    H = params["embedding"].shape[1]

    x = params["embedding"][tokens].astype(act_dtype)   # (B, T, H) gather (glue)
    # input_dropout: identity (eval mode)

    h_states, c_states = [], []
    for layer in params["lstm"]:
        pregates = input_projection(
            x.reshape(B * T, H), layer["w_ih_t"], layer["b"], act_dtype
        ).reshape(B, T, 4 * H)
        x, hT, cT = lstm_layer(pregates, layer["w_hh_t"], act_dtype)
        # inter-layer LSTM dropout: identity (eval mode)
        h_states.append(hT)
        c_states.append(cT)

    logp = output_logsoftmax(
        x.reshape(B * T, H), params["w_out_t"], params["b_out"])
    V = params["w_out_t"].shape[1]
    output = logp.reshape(B, T, V)
    states = (jnp.stack(h_states, axis=0), jnp.stack(c_states, axis=0))
    return output, states


# ----------------------------------------------------------------------------
# Pure-JAX reference (same math, gate column order [i, f, o, g]).
# ----------------------------------------------------------------------------
def reference_forward(params, tokens):
    emb = params["embedding"][tokens].astype(jnp.float32)
    B, T, H = emb.shape
    x = emb
    for layer in params["lstm"]:
        w_ih = layer["w_ih_t"].astype(jnp.float32)
        w_hh = layer["w_hh_t"].astype(jnp.float32)
        b = layer["b"][0]
        h = jnp.zeros((B, H), jnp.float32)
        c = jnp.zeros((B, H), jnp.float32)
        outs = []
        for t in range(T):
            gates = x[:, t] @ w_ih + h @ w_hh + b
            i = jax.nn.sigmoid(gates[:, 0 * H:1 * H])
            f = jax.nn.sigmoid(gates[:, 1 * H:2 * H])
            o = jax.nn.sigmoid(gates[:, 2 * H:3 * H])
            g = jnp.tanh(gates[:, 3 * H:])
            c = f * c + i * g
            h = o * jnp.tanh(c)
            outs.append(h)
        x = jnp.stack(outs, axis=1)
    logits = (x.reshape(B * T, H) @ params["w_out_t"].astype(jnp.float32)
              + params["b_out"][0])
    return jax.nn.log_softmax(logits, axis=-1).reshape(B, T, -1)


# ----------------------------------------------------------------------------
# Deterministic parameter init (shapes per nn.Embedding / nn.LSTM / nn.Linear).
# PyTorch gate row order [i, f, g, o] is reordered to [i, f, o, g] and the
# weights are pre-transposed so the kernels compute x @ W.  param_dtype may be
# jnp.bfloat16 (f32 accumulation in the kernels; biases stay f32).
# ----------------------------------------------------------------------------
def init_params(key, vocab_size, hidden_size, num_layers,
                param_dtype=jnp.float32):
    H = hidden_size
    k_scale = 1.0 / np.sqrt(H)
    keys = jax.random.split(key, 2 + 4 * num_layers)

    def reorder(m):  # row blocks [i, f, g, o] -> [i, f, o, g]
        return jnp.concatenate([m[:2 * H], m[3 * H:], m[2 * H:3 * H]], axis=0)

    params = {
        "embedding": jax.random.normal(
            keys[0], (vocab_size, H), jnp.float32).astype(param_dtype),
        "lstm": [],
    }
    for l in range(num_layers):
        kw1, kw2, kb1, kb2 = keys[2 + 4 * l: 2 + 4 * (l + 1)]
        w_ih = jax.random.uniform(kw1, (4 * H, H), jnp.float32, -k_scale, k_scale)
        w_hh = jax.random.uniform(kw2, (4 * H, H), jnp.float32, -k_scale, k_scale)
        b_ih = jax.random.uniform(kb1, (4 * H,), jnp.float32, -k_scale, k_scale)
        b_hh = jax.random.uniform(kb2, (4 * H,), jnp.float32, -k_scale, k_scale)
        params["lstm"].append({
            "w_ih_t": reorder(w_ih).T.astype(param_dtype),        # (H, 4H)
            "w_hh_t": reorder(w_hh).T.astype(param_dtype),        # (H, 4H)
            "b": reorder(b_ih + b_hh).reshape(1, 4 * H),          # f32
        })
    w_out = jax.random.uniform(keys[1], (vocab_size, H),
                               jnp.float32, -k_scale, k_scale)
    params["w_out_t"] = w_out.T.astype(param_dtype)               # (H, V)
    params["b_out"] = jnp.zeros((1, vocab_size), jnp.float32)
    return params


if __name__ == "__main__":
    VOCAB = 64
    HIDDEN = 32
    LAYERS = 2
    BATCH = 16   # >= 16 so the batch grid axis gets 2 blocks (megacore path)
    SEQ = 8

    key = jax.random.PRNGKey(0)
    pkey, tkey = jax.random.split(key)
    tokens = jax.random.randint(tkey, (BATCH, SEQ), 0, VOCAB, dtype=jnp.int32)

    # --- f32 config: tight check against the pure-JAX reference -------------
    params_f32 = init_params(pkey, VOCAB, HIDDEN, LAYERS, param_dtype=jnp.float32)
    out_f32, (h_n, c_n) = lstm_lm_forward(params_f32, tokens,
                                          act_dtype=jnp.float32)
    out_f32 = jax.block_until_ready(out_f32)
    h_n = jax.block_until_ready(h_n)
    c_n = jax.block_until_ready(c_n)

    assert out_f32.shape == (BATCH, SEQ, VOCAB)
    assert h_n.shape == (LAYERS, BATCH, HIDDEN)
    assert c_n.shape == (LAYERS, BATCH, HIDDEN)

    ref = jax.block_until_ready(reference_forward(params_f32, tokens))
    max_err = float(jnp.max(jnp.abs(out_f32 - ref)))
    if max_err > 1e-2:
        raise AssertionError(f"f32 mismatch vs pure-JAX reference: {max_err}")

    # --- bf16 config: production path (bf16 weights / activations / pre-gates)
    params_bf16 = init_params(pkey, VOCAB, HIDDEN, LAYERS,
                              param_dtype=jnp.bfloat16)
    out_bf16, _ = lstm_lm_forward(params_bf16, tokens, act_dtype=jnp.bfloat16)
    out_bf16 = jax.block_until_ready(out_bf16)
    assert out_bf16.shape == (BATCH, SEQ, VOCAB)
    max_err_bf16 = float(jnp.max(jnp.abs(out_bf16 - ref)))
    if max_err_bf16 > 0.5:   # loose: pre-gates rounded to bf16 before sigmoid/tanh
        raise AssertionError(f"bf16 mismatch vs reference: {max_err_bf16}")

    print("KERNEL_OK")
</pallas_src>

<mosaic_0001>
module attributes {stable_mosaic.version = 11 : i64} {
  func.func @_pregates_kernel(%arg0: i32, %arg1: memref<128x32xf32, #tpu.memory_space<vmem>>, %arg2: memref<32x128xf32, #tpu.memory_space<vmem>>, %arg3: memref<1x128xf32, #tpu.memory_space<vmem>>, %arg4: memref<128x128xf32, #tpu.memory_space<vmem>>) attributes {dimension_semantics = [#tpu.dimension_semantics<parallel>], iteration_bounds = array<i64: 1>, scalar_prefetch = 0 : i64, scratch_operands = 0 : i64, tpu.core_type = #tpu.core_type<tc>, window_params = [{transform_indices = @transform_0, window_bounds = array<i64: 128, 32>}, {pipeline_mode = #tpu.pipeline_mode<synchronous>, transform_indices = @transform_1, window_bounds = array<i64: 32, 128>}, {pipeline_mode = #tpu.pipeline_mode<synchronous>, transform_indices = @transform_2, window_bounds = array<i64: 1, 128>}, {transform_indices = @transform_3, window_bounds = array<i64: 128, 128>}]} {
    %c0 = arith.constant 0 : index
    %c0_0 = arith.constant 0 : index
    %0 = vector.load %arg1[%c0, %c0_0] : memref<128x32xf32, #tpu.memory_space<vmem>>, vector<128x32xf32>
    %c0_1 = arith.constant 0 : index
    %c0_2 = arith.constant 0 : index
    %1 = vector.load %arg2[%c0_1, %c0_2] : memref<32x128xf32, #tpu.memory_space<vmem>>, vector<32x128xf32>
    %cst = arith.constant dense<0.000000e+00> : vector<128x128xf32>
    %2 = tpu.matmul %0, %1, %cst {dimension_numbers = #tpu.dot_dimension_numbers<[1], [0], [0], [1], [0, 0, 1, 1], [], []>} : vector<128x32xf32>, vector<32x128xf32>, vector<128x128xf32> -> vector<128x128xf32>
    %c0_3 = arith.constant 0 : index
    %c0_4 = arith.constant 0 : index
    %3 = vector.load %arg3[%c0_3, %c0_4] : memref<1x128xf32, #tpu.memory_space<vmem>>, vector<1x128xf32>
    %4 = vector.broadcast %3 : vector<1x128xf32> to vector<128x128xf32>
    %5 = arith.addf %2, %4 : vector<128x128xf32>
    %c0_5 = arith.constant 0 : index
    %c0_6 = arith.constant 0 : index
    %6 = vector.load %arg4[%c0_5, %c0_6] : memref<128x128xf32, #tpu.memory_space<vmem>>, vector<128x128xf32>
    tpu.vector_store %arg4[%c0_5, %c0_6], %5 {strides = array<i32>} : memref<128x128xf32, #tpu.memory_space<vmem>>, vector<128x128xf32>,
    return
  }
  func.func @transform_0(%arg0: i32) -> (i32, i32) {
    %c0_i32 = arith.constant 0 : i32
    %c0_i32_0 = arith.constant 0 : i32
    return %arg0, %c0_i32 : i32, i32
  }
  func.func @transform_1(%arg0: i32) -> (i32, i32) {
    %c0_i32 = arith.constant 0 : i32
    %c0_i32_0 = arith.constant 0 : i32
    %c0_i32_1 = arith.constant 0 : i32
    return %c0_i32, %c0_i32_0 : i32, i32
  }
  func.func @transform_2(%arg0: i32) -> (i32, i32) {
    %c0_i32 = arith.constant 0 : i32
    %c0_i32_0 = arith.constant 0 : i32
    %c0_i32_1 = arith.constant 0 : i32
    return %c0_i32, %c0_i32_0 : i32, i32
  }
  func.func @transform_3(%arg0: i32) -> (i32, i32) {
    %c0_i32 = arith.constant 0 : i32
    %c0_i32_0 = arith.constant 0 : i32
    return %arg0, %c0_i32 : i32, i32
  }
}

</mosaic_0001>

<bundles_post_ra>
// kernel: tpu_custom_call.1
= control target key start
LH: loop header
LB: loop body
LE: loop exit
PB: predicated region body
PF: predicated region fallthrough
CT: control target
= control target key end

     0   :  { %8 = vsyncpa [#allocation3], 0  ;;  %s596_s0 = inlined_call_operand.hbm [shape: f32[128,32], index: 0, kind: input, shape index: {}]   ;;  %s597_s1 = inlined_call_operand.hbm [shape: f32[32,128], index: 1, kind: input, shape index: {}]   ;;  %s598_s2 = inlined_call_operand.hbm [shape: f32[1,128], index: 2, kind: input, shape index: {}]   ;;  %s599_s3 = inlined_call_operand.hbm [shape: f32[128,128], index: 3, kind: output, shape index: {}]  }
   0x1   :  { %9 = vsyncpa [#allocation6], 0 }
   0x2   :  { %10 = vsyncpa [#allocation4], 0  ;;  %s490_s12 = smov [#allocation5]   ;;  %s491_s14 = smov [#allocation2]  }
   0x3   :  { %s28_s13 = sshll.u32 %s490_s12, 4  ;;  %s16_s15 = sshll.u32 %s491_s14, 4  ;;  %s29_s13 = int_to_ptr.vmem [resolvable:$true] %s28_s13  ;;  %s516_s15 = int_to_ptr.vmem [resolvable:$true] %s16_s15 }
   0x4   :  { %s396_s18 = scalar_lea.hbm %s597_s1, 512 }
   0x5   :  { %p397_p0 = scmp.ne.s32.totalorder %s597_s1, %s396_s18  ;;  %p400_p1 = scmp.lt.u32.totalorder %s396_s18, %s597_s1 }
   0x7   :  { %p402_p2 = pnand %p400_p1, %p397_p0 }
   0x9   :  { %405 = shalt.err (!%p402_p2)
}
   0xa   :  { %s406_s23 = scalar_lea.vmem %s29_s13, 512  ;;  %p411_p4 = scmp.lt.s32.totalorder %s29_s13, %s29_s13 }
   0xb   :  { %p407_p3 = scmp.ne.s32.totalorder %s29_s13, %s406_s23  ;;  %p412_p5 = scmp.lt.s32.totalorder %s406_s23, %s406_s23 }
   0xd   :  { %p413_p6 = por %p412_p5, %p411_p4 }
   0xf   :  { %p414_p7 = pnand %p413_p6, %p407_p3 }
  0x11   :  { %417 = shalt.err (!%p414_p7)
}
  0x12   :  { %s492_s24 = smov 128   ;;  %s493_s25 = smov 8  }
  0x13   :  { %34 = dma.hbm_to_vmem [thread:$0]  %s597_s1, 512, %s29_s13, [#allocation6], %s492_s24, %s492_s24, %s493_s25  }
  0x14   :  { %s418_s30 = scalar_lea.hbm %s596_s0, 2048 }
  0x15   :  { %p419_p8 = scmp.ne.s32.totalorder %s596_s0, %s418_s30  ;;  %p422_p9 = scmp.lt.u32.totalorder %s418_s30, %s596_s0 }
  0x17   :  { %p424_p10 = pnand %p422_p9, %p419_p8 }
  0x19   :  { %427 = shalt.err (!%p424_p10)
}
  0x1a   :  { %s428_s8 = scalar_lea.vmem %s516_s15, 2048  ;;  %p433_p12 = scmp.lt.s32.totalorder %s516_s15, %s516_s15 }
  0x1b   :  { %p429_p11 = scmp.ne.s32.totalorder %s516_s15, %s428_s8  ;;  %p434_p13 = scmp.lt.s32.totalorder %s428_s8, %s428_s8 }
  0x1d   :  { %p435_p0 = por %p434_p13, %p433_p12 }
  0x1f   :  { %p436_p1 = pnand %p435_p0, %p429_p11 }
  0x21   :  { %439 = shalt.err (!%p436_p1)
}
  0x22   :  { %22 = dma.hbm_to_vmem [thread:$0]  %s596_s0, 2048, %s516_s15, [#allocation3], %s492_s24, %s492_s24, %s493_s25  }
  0x23   :  { %s494_s10 = smov [#allocation7]   ;;  %s440_s14 = scalar_lea.hbm %s598_s2, 16 }
  0x24   :  { %s41_s11 = sshll.u32 %s494_s10, 4  ;;  %p441_p2 = scmp.ne.s32.totalorder %s598_s2, %s440_s14  ;;  %s42_s11 = int_to_ptr.vmem [resolvable:$true] %s41_s11 }
  0x25   :  { %p444_p3 = scmp.lt.u32.totalorder %s440_s14, %s598_s2 }
  0x27   :  { %p446_p4 = pnand %p444_p3, %p441_p2 }
  0x29   :  { %449 = shalt.err (!%p446_p4)
}
  0x2a   :  { %s450_s20 = scalar_lea.vmem %s42_s11, 16  ;;  %s454_s0 = scalar_lea.vmem %s42_s11, 32 }
  0x2b   :  { %p451_p5 = scmp.ne.s32.totalorder %s42_s11, %s450_s20  ;;  %p455_p6 = scmp.lt.s32.totalorder %s42_s11, %s42_s11 }
  0x2c   :  { %p456_p7 = scmp.lt.s32.totalorder %s454_s0, %s450_s20 }
  0x2e   :  { %p457_p8 = por %p456_p7, %p455_p6 }
  0x30   :  { %p458_p9 = pnand %p457_p8, %p451_p5 }
  0x32   :  { %461 = shalt.err (!%p458_p9)
}
  0x33   :  { %44 = dma.hbm_to_vmem [thread:$0]  %s598_s2, 16, %s42_s11, [#allocation6]  }
  0x34   :  { %484 = dma.done.wait [#allocation3], 2048  }
  0x35   :  { %485 = vsyncadd [#allocation3], 4294965248 }
  0x36   :  { %486 = dma.done.wait [#allocation6], 528  }
  0x37   :  { %487 = vsyncadd [#allocation6], 4294966768  ;;  %vm81_vm0 = vcmask 261120   ;;  %v70_v0 = vld [vmem:[#allocation5] sm:$0xff]  ;;  %v71_v1 = vld [vmem:[#allocation5 + $0x8] sm:$0xff]  ;;  %s495_s2 = smov [#allocation8]  }
  0x38   :  { %v72_v2 = vld [vmem:[#allocation5 + $0x10] sm:$0xff]  ;;  %v378_v3 = vpack.c.bf16 %v71_v1, %v70_v0  ;;  %v73_v4 = vld [vmem:[#allocation5 + $0x18] sm:$0xff]  ;;  %v54_v5 = vld [vmem:[#allocation2] sm:$0xff]  ;;  %s296_s22 = sshll.u32 %s495_s2, 4  ;;  %s297_s22 = int_to_ptr.vmem [resolvable:$true] %s296_s22 }
  0x39   :  { %v62_v6 = vld [vmem:[#allocation2 + $0x40] sm:$0xff]  ;;  %v382_v7 = vpack.c.bf16 %v73_v4, %v72_v2  ;;  %354 = vmatprep.mubr.msk.f32.mxu0 %vm81_vm0, %v54_v5  ;;  %v55_v8 = vld [vmem:[#allocation2 + $0x8] sm:$0xff]  ;;  %v56_v10 = vld [vmem:[#allocation2 + $0x10] sm:$0xff]  ;;  %s462_s23 = scalar_lea.vmem %s297_s22, 2048  ;;  %p467_p11 = scmp.lt.s32.totalorder %s297_s22, %s297_s22 }
  0x3a   :  { %366 = vmatprep.mubr.msk.f32.mxu1 %vm81_vm0, %v62_v6  ;;  %379 = vmatprep.subr.bf16.mxu0 %v378_v3  ;;  %v63_v9 = vld [vmem:[#allocation2 + $0x48] sm:$0xff]  ;;  %v64_v11 = vld [vmem:[#allocation2 + $0x50] sm:$0xff]  ;;  %v57_v12 = vld [vmem:[#allocation2 + $0x18] sm:$0xff]  ;;  %p463_p10 = scmp.ne.s32.totalorder %s297_s22, %s462_s23  ;;  %p468_p12 = scmp.lt.s32.totalorder %s462_s23, %s462_s23 }
  0x3b   :  { %386 = vmatprep.subr.bf16.mxu1 %v378_v3  ;;  %381 = vmatpush3.bf16.msra.mxu0 %v378_v3  ;;  %v65_v13 = vld [vmem:[#allocation2 + $0x58] sm:$0xff]  ;;  %v58_v14 = vld [vmem:[#allocation2 + $0x20] sm:$0xff]  ;;  %v59_v16 = vld [vmem:[#allocation2 + $0x28] sm:$0xff] }
  0x3c   :  { %388 = vmatpush3.bf16.msra.mxu1 %v378_v3  ;;  %383 = vmatprep.subr.bf16.mxu0 %v382_v7  ;;  %v66_v15 = vld [vmem:[#allocation2 + $0x60] sm:$0xff]  ;;  %v67_v17 = vld [vmem:[#allocation2 + $0x68] sm:$0xff]  ;;  %v60_v18 = vld [vmem:[#allocation2 + $0x30] sm:$0xff]  ;;  %p469_p13 = por %p468_p12, %p467_p11 }
  0x3d   :  { %387 = vmatprep.subr.bf16.mxu1 %v382_v7  ;;  %v68_v19 = vld [vmem:[#allocation2 + $0x70] sm:$0xff]  ;;  %v61_v20 = vld [vmem:[#allocation2 + $0x38] sm:$0xff]  ;;  %v309_v22 = vld [vmem:[#allocation7] ss:$0 sm:$0xff] }
  0x3e   :  { %v69_v21 = vld [vmem:[#allocation2 + $0x78] sm:$0xff]  ;;  %p470_p0 = pnand %p469_p13, %p463_p10 }
  0x3f   :  { %385 = vmatpush3.bf16.msra.mxu0 %v382_v7 }
  0x40   :  { %389 = vmatpush3.bf16.msra.mxu1 %v382_v7 }
  0x42   :  { %355 = vmatmul.mubr.msk.f32.vlgmr.msra.gmra.mrb[0].mxu0 %vm81_vm0, %v55_v8 }
  0x43   :  { %367 = vmatmul.mubr.msk.f32.vlgmr.msra.gmra.mrb[0].mxu1 %vm81_vm0, %v63_v9  ;;  %357 = vmatprep.mubr.msk.f32.mxu0 %vm81_vm0, %v56_v10 }
  0x44   :  { %369 = vmatprep.mubr.msk.f32.mxu1 %vm81_vm0, %v64_v11 }
  0x46   :  { %358 = vmatmul.mubr.msk.f32.gmra.mrb[2].mxu0 %vm81_vm0, %v57_v12 }
  0x47   :  { %370 = vmatmul.mubr.msk.f32.gmra.mrb[2].mxu1 %vm81_vm0, %v65_v13  ;;  %360 = vmatprep.mubr.msk.f32.mxu0 %vm81_vm0, %v58_v14 }
  0x48   :  { %372 = vmatprep.mubr.msk.f32.mxu1 %vm81_vm0, %v66_v15 }
  0x4a   :  { %361 = vmatmul.mubr.msk.f32.gmra.mrb[4].mxu0 %vm81_vm0, %v59_v16 }
  0x4b   :  { %373 = vmatmul.mubr.msk.f32.gmra.mrb[4].mxu1 %vm81_vm0, %v67_v17  ;;  %363 = vmatprep.mubr.msk.f32.mxu0 %vm81_vm0, %v60_v18 }
  0x4c   :  { %375 = vmatprep.mubr.msk.f32.mxu1 %vm81_vm0, %v68_v19 }
  0x4e   :  { %364 = vmatmul.mubr.msk.f32.gmra.mrb[6].mxu0 %vm81_vm0, %v61_v20 }
  0x4f   :  { %376 = vmatmul.mubr.msk.f32.gmra.mrb[6].mxu1 %vm81_vm0, %v69_v21 }
 0x115   :  { %v356_v23 = vpop.f32.mrb[0].mxu0 }
 0x116   :  { %v368_v24 = vpop.f32.mrb[0].mxu1  ;;  %v202_v25 = vadd.f32 %v356_v23, %v309_v22  ;;  %v196_v27 = vpop.f32.mrb[1].mxu0 }
 0x117   :  { %v242_v26 = vadd.f32 %v368_v24, %v309_v22  ;;  %v236_v28 = vpop.f32.mrb[1].mxu1  ;;  %v197_v29 = vadd.f32 %v309_v22, %v196_v27 }
 0x118   :  { %v237_v30 = vadd.f32 %v309_v22, %v236_v28  ;;  %276 = vst [vmem:[#allocation8 + $0x8] sm:$0xff] %v202_v25 }
 0x119   :  { %284 = vst [vmem:[#allocation8 + $0x48] sm:$0xff] %v242_v26  ;;  %275 = vst [vmem:[#allocation8] sm:$0xff] %v197_v29  ;;  %v359_v31 = vpop.f32.mrb[2].mxu0 }
 0x11a   :  { %283 = vst [vmem:[#allocation8 + $0x40] sm:$0xff] %v237_v30  ;;  %v371_v32 = vpop.f32.mrb[2].mxu1  ;;  %v212_v33 = vadd.f32 %v359_v31, %v309_v22  ;;  %v206_v35 = vpop.f32.mrb[3].mxu0 }
 0x11b   :  { %v252_v34 = vadd.f32 %v371_v32, %v309_v22  ;;  %v246_v36 = vpop.f32.mrb[3].mxu1  ;;  %v207_v37 = vadd.f32 %v309_v22, %v206_v35 }
 0x11c   :  { %v247_v38 = vadd.f32 %v309_v22, %v246_v36  ;;  %278 = vst [vmem:[#allocation8 + $0x18] sm:$0xff] %v212_v33 }
 0x11d   :  { %286 = vst [vmem:[#allocation8 + $0x58] sm:$0xff] %v252_v34  ;;  %277 = vst [vmem:[#allocation8 + $0x10] sm:$0xff] %v207_v37  ;;  %v362_v39 = vpop.f32.mrb[4].mxu0 }
 0x11e   :  { %285 = vst [vmem:[#allocation8 + $0x50] sm:$0xff] %v247_v38  ;;  %v374_v40 = vpop.f32.mrb[4].mxu1  ;;  %v222_v41 = vadd.f32 %v362_v39, %v309_v22  ;;  %v216_v43 = vpop.f32.mrb[5].mxu0 }
 0x11f   :  { %v262_v42 = vadd.f32 %v374_v40, %v309_v22  ;;  %v256_v44 = vpop.f32.mrb[5].mxu1  ;;  %v217_v45 = vadd.f32 %v309_v22, %v216_v43 }
 0x120   :  { %v257_v46 = vadd.f32 %v309_v22, %v256_v44  ;;  %280 = vst [vmem:[#allocation8 + $0x28] sm:$0xff] %v222_v41 }
 0x121   :  { %288 = vst [vmem:[#allocation8 + $0x68] sm:$0xff] %v262_v42  ;;  %279 = vst [vmem:[#allocation8 + $0x20] sm:$0xff] %v217_v45  ;;  %v365_v47 = vpop.f32.mrb[6].mxu0 }
 0x122   :  { %287 = vst [vmem:[#allocation8 + $0x60] sm:$0xff] %v257_v46  ;;  %v377_v48 = vpop.f32.mrb[6].mxu1  ;;  %v232_v49 = vadd.f32 %v365_v47, %v309_v22  ;;  %v226_v51 = vpop.f32.mrb[7].mxu0 }
 0x123   :  { %v272_v50 = vadd.f32 %v377_v48, %v309_v22  ;;  %v266_v52 = vpop.f32.mrb[7].mxu1  ;;  %v227_v53 = vadd.f32 %v309_v22, %v226_v51 }
 0x124   :  { %v267_v54 = vadd.f32 %v309_v22, %v266_v52  ;;  %282 = vst [vmem:[#allocation8 + $0x38] sm:$0xff] %v232_v49 }
 0x125   :  { %290 = vst [vmem:[#allocation8 + $0x78] sm:$0xff] %v272_v50  ;;  %281 = vst [vmem:[#allocation8 + $0x30] sm:$0xff] %v227_v53 }
 0x126   :  { %289 = vst [vmem:[#allocation8 + $0x70] sm:$0xff] %v267_v54 }
 0x127   :  { %473 = shalt.err (!%p470_p0)
}
 0x128   :  { %s474_s28 = scalar_lea.hbm %s599_s3, 2048 }
 0x129   :  { %p475_p1 = scmp.ne.s32.totalorder %s599_s3, %s474_s28  ;;  %p478_p2 = scmp.lt.u32.totalorder %s474_s28, %s599_s3 }
 0x12b   :  { %p480_p3 = pnand %p478_p2, %p475_p1 }
 0x12d   :  { %483 = shalt.err (!%p480_p3)
}
 0x12e   :  { %302 = dma.vmem_to_hbm [thread:$0]  %s297_s22, 2048, %s599_s3, [#allocation4], %s492_s24, %s492_s24, %s493_s25  }
 0x12f   :  { %488 = dma.done.wait [#allocation4], 2048  }
 0x130   :  { %489 = vsyncadd [#allocation4], 4294965248 }
 0x131   :  { %306 = vsyncpa [#allocation3], 1 }
 0x132   :  { %307 = vsyncpa [#allocation6], 1 }
 0x133   :  { %308 = vsyncpa [#allocation4], 1 }

</bundles_post_ra>
